<compile_context>
chip_gen: v7x
topology: tpu7x:2x2x1
jax: 0.10.0
libtpu: 0.0.40
codegen_flags: <defaults>
</compile_context>

<pallas_src>
import functools
import math

import jax
import jax.numpy as jnp
from jax.experimental import pallas as pl
from jax.experimental.pallas import tpu as pltpu

LANE = 128
SUBLANE_BF16 = 16  # bf16 packs 2 rows per sublane -> (16, 128) tiles


def _round_up(v, m):
    return (v + m - 1) // m * m


# ---------------------------------------------------------------------------
# Fused kernel: whole network for one batch tile.
# ---------------------------------------------------------------------------
def _dnn_fused_kernel(*refs, num_layers, skips):
    """refs = (x_ref, <per-layer: wx, [wid], bias ...>, o_ref).

    x_ref : (TN, in_pad)        bf16, zero-padded input tile (also the skip identity)
    wx_l  : (k_pad_l, n_pad_l)  bf16, main weight of layer l
    wid_l : (in_pad, n_pad_l)   bf16, skip weight (only for layers in `skips`)
    b_l   : (1, n_pad_l)        f32 bias
    o_ref : (TN, out_pad)       f32 output tile
    """
    x_ref, o_ref = refs[0], refs[-1]
    layer_refs = refs[1:-1]

    ptr = 0
    act = None
    for l in range(num_layers):  # static unroll; num_layers is tiny
        wx_ref = layer_refs[ptr]; ptr += 1
        # Re-read the VMEM-resident x tile at its use sites instead of keeping a
        # hoisted f32 copy live across all layers (avoids register spills).
        lhs = x_ref[...] if l == 0 else act
        y = jnp.dot(lhs, wx_ref[...], preferred_element_type=jnp.float32)
        if l in skips:
            wid_ref = layer_refs[ptr]; ptr += 1
            # torch.cat([x, identity], -1) @ W  ==  x @ W_x + identity @ W_id
            y = y + jnp.dot(x_ref[...], wid_ref[...],
                            preferred_element_type=jnp.float32)
        b_ref = layer_refs[ptr]; ptr += 1
        y = jnp.maximum(y + b_ref[...], 0.0)  # FCLayer = Linear + ReLU (all layers)
        if l + 1 == num_layers:
            o_ref[...] = y.astype(o_ref.dtype)
        else:
            act = y.astype(jnp.bfloat16)  # next layer's matmul consumes bf16


# ---------------------------------------------------------------------------
# Parameter construction (mirrors the PyTorch module's layer shapes).
# Weights are stored (d_in, d_out), i.e. transposed vs. torch.nn.Linear.
# ---------------------------------------------------------------------------
def init_linear_params(key, in_dim, out_dim):
    kw, kb = jax.random.split(key)
    bound = 1.0 / math.sqrt(in_dim)
    w = jax.random.uniform(kw, (in_dim, out_dim), jnp.float32, -bound, bound)
    b = jax.random.uniform(kb, (out_dim,), jnp.float32, -bound, bound)
    return w, b


def make_dnn_params(key, input_dim, hidden_dims, output_dim, skips):
    if isinstance(hidden_dims, int):
        hidden_dims = [hidden_dims]
    dims = [(input_dim, hidden_dims[0])]
    for i in range(1, len(hidden_dims)):
        in_dim = hidden_dims[i - 1]
        if i in skips:
            in_dim += input_dim
        dims.append((in_dim, hidden_dims[i]))
    dims.append((hidden_dims[-1], output_dim))
    return [init_linear_params(jax.random.fold_in(key, i), din, dout)
            for i, (din, dout) in enumerate(dims)]


def pack_dnn_params(params, input_dim, skips):
    """One-time packing: split skip-layer weights into (W_x, W_id), cast to bf16,
    zero-pad each layer only to its own 128-lane-aligned shape, and return a flat
    list [wx_0, (wid_0,) b_0, wx_1, ...] plus the validated skip tuple."""
    num_layers = len(params)
    # Only hidden-layer skips are shape-consistent in the torch module (a skip at
    # layer 0 or the output layer would fail there too); the assert below catches
    # any remaining mismatch at pack time rather than computing silently wrong.
    skips = tuple(sorted({int(s) for s in skips if 0 < int(s) < num_layers}))
    in_pad = _round_up(input_dim, LANE)

    packed = []
    prev = input_dim
    for l, (w, b) in enumerate(params):
        d_out = w.shape[1]
        k_pad = _round_up(prev, LANE)
        n_pad = _round_up(d_out, LANE)
        if l in skips:
            # torch concat order is [x, identity]: rows [0:prev] act on the
            # current activation, rows [prev:prev+input_dim] on the identity.
            assert w.shape[0] == prev + input_dim, (l, w.shape, prev, input_dim)
            wx = jnp.zeros((k_pad, n_pad), jnp.bfloat16)
            wx = wx.at[:prev, :d_out].set(w[:prev, :].astype(jnp.bfloat16))
            wid = jnp.zeros((in_pad, n_pad), jnp.bfloat16)
            wid = wid.at[:input_dim, :d_out].set(w[prev:, :].astype(jnp.bfloat16))
            packed += [wx, wid]
        else:
            assert w.shape[0] == prev, (l, w.shape, prev)
            wx = jnp.zeros((k_pad, n_pad), jnp.bfloat16)
            wx = wx.at[:prev, :d_out].set(w.astype(jnp.bfloat16))
            packed.append(wx)
        bias = jnp.zeros((1, n_pad), jnp.float32).at[0, :d_out].set(b)
        packed.append(bias)
        prev = d_out
    return packed, skips


# ---------------------------------------------------------------------------
# Batch tiling heuristic.
# ---------------------------------------------------------------------------
def _choose_batch_tile(n, block_rows):
    """tn is a multiple of 16 (bf16 sublane tile).  Small batches: one tile
    (overhead-bound anyway).  Medium batches: two even tiles so the 'parallel'
    grid axis can use both v7x TensorCores.  Large batches: maximal tiles."""
    n16 = _round_up(max(n, SUBLANE_BF16), SUBLANE_BF16)
    if n16 <= 256:
        tn = n16
    elif n16 <= 2 * block_rows:
        tn = _round_up((n16 + 1) // 2, SUBLANE_BF16)
    else:
        tn = block_rows
    n_pad = _round_up(n16, tn)
    return tn, n_pad


# ---------------------------------------------------------------------------
# Forward pass: single fused pallas_call, batch tiled + "parallel".
# ---------------------------------------------------------------------------
@functools.partial(jax.jit, static_argnames=("skips", "output_dim", "block_rows"))
def deep_neural_network_forward(x, packed, *, skips, output_dim, block_rows=1024):
    n, d_in = x.shape
    num_layers = (len(packed) - len(skips)) // 2
    in_pad = packed[0].shape[0]      # round_up(input_dim, 128)
    out_pad = packed[-1].shape[1]    # round_up(output_dim, 128)
    assert d_in <= in_pad and output_dim <= out_pad

    tn, n_pad = _choose_batch_tile(n, block_rows)
    grid_n = n_pad // tn

    # TODO(synk): for very large batches, skip this extra HBM pad pass and handle
    # the ragged last batch tile inside the kernel instead.
    xp = jnp.pad(x.astype(jnp.bfloat16), ((0, n_pad - n), (0, in_pad - d_in)))

    # Weight / bias specs: constant index_map across the grid -> single-buffered,
    # VMEM-resident for the whole kernel.
    in_specs = [pl.BlockSpec((tn, in_pad), lambda i: (i, 0))]
    in_specs += [pl.BlockSpec(a.shape, lambda i: (0, 0),
                              pipeline_mode=pl.Buffered(1))
                 for a in packed]

    # Explicit VMEM budget: single-buffered weights + double-buffered x/out tiles,
    # with generous headroom (stays well under v7x's 64 MiB physical VMEM).
    weight_bytes = sum(int(a.size) * a.dtype.itemsize for a in packed)
    io_bytes = 2 * tn * in_pad * 2 + 2 * tn * out_pad * 4
    vmem_limit = int(min(64 << 20, 2 * weight_bytes + 2 * io_bytes + (4 << 20)))

    kernel = functools.partial(_dnn_fused_kernel,
                               num_layers=num_layers, skips=skips)

    out = pl.pallas_call(
        kernel,
        out_shape=jax.ShapeDtypeStruct((n_pad, out_pad), jnp.float32),
        grid_spec=pltpu.PrefetchScalarGridSpec(
            num_scalar_prefetch=0,
            grid=(grid_n,),
            in_specs=in_specs,
            out_specs=pl.BlockSpec((tn, out_pad), lambda i: (i, 0)),
        ),
        compiler_params=pltpu.CompilerParams(
            dimension_semantics=("parallel",),   # megacore-shardable batch axis
            vmem_limit_bytes=vmem_limit,
        ),
    )(xp, *packed)

    return out[:n, :output_dim]


# ---------------------------------------------------------------------------
# Pure-JAX references of the PyTorch forward (for correctness checking).
# ---------------------------------------------------------------------------
def _reference_forward(x, params, skips, cast=None):
    identity = x if cast is None else x.astype(cast)
    h = identity
    for idx, (w, b) in enumerate(params):
        if idx in skips:
            h = jnp.concatenate([h, identity], axis=-1)
        wc = w if cast is None else w.astype(cast)
        h = jnp.maximum(jnp.dot(h, wc, preferred_element_type=jnp.float32) + b, 0.0)
        if cast is not None and idx + 1 < len(params):
            h = h.astype(cast)
    return h


if __name__ == "__main__":
    # Small shapes consistent with the module: batch=8, input_dim=16,
    # hidden_dims=[32, 32] with a skip before hidden layer 1, output_dim=16.
    input_dim = 16
    hidden_dims = [32, 32]
    output_dim = 16
    skips = (1,)
    batch = 8

    key = jax.random.PRNGKey(0)
    k_x, k_p = jax.random.split(key)

    x = jax.random.normal(k_x, (batch, input_dim), jnp.float32)
    params = make_dnn_params(k_p, input_dim, hidden_dims, output_dim, set(skips))

    packed, skips_t = pack_dnn_params(params, input_dim, skips)

    out = deep_neural_network_forward(x, packed, skips=skips_t,
                                      output_dim=output_dim)
    out = jax.block_until_ready(out)

    assert out.shape == (batch, output_dim), out.shape
    assert bool(jnp.all(jnp.isfinite(out)))

    # f32 reference (loose tolerance: kernel runs bf16 weights/activations).
    ref_f32 = _reference_forward(x, params, skips_t)
    assert bool(jnp.allclose(out, ref_f32, rtol=5e-2, atol=5e-2)), \
        "mismatch vs f32 reference"

    # Reference that mimics the kernel's bf16 numerics (tight tolerance).
    ref_bf16 = _reference_forward(x, params, skips_t, cast=jnp.bfloat16)
    assert bool(jnp.allclose(out, ref_bf16, rtol=1e-2, atol=1e-2)), \
        "mismatch vs bf16 reference"

    print("KERNEL_OK")
</pallas_src>

<mosaic_0001>
module attributes {stable_mosaic.version = 11 : i64} {
  func.func @_dnn_fused_kernel(%arg0: i32, %arg1: memref<16x128xbf16, #tpu.memory_space<vmem>>, %arg2: memref<128x128xbf16, #tpu.memory_space<vmem>>, %arg3: memref<1x128xf32, #tpu.memory_space<vmem>>, %arg4: memref<128x128xbf16, #tpu.memory_space<vmem>>, %arg5: memref<128x128xbf16, #tpu.memory_space<vmem>>, %arg6: memref<1x128xf32, #tpu.memory_space<vmem>>, %arg7: memref<128x128xbf16, #tpu.memory_space<vmem>>, %arg8: memref<1x128xf32, #tpu.memory_space<vmem>>, %arg9: memref<16x128xf32, #tpu.memory_space<vmem>>) attributes {dimension_semantics = [#tpu.dimension_semantics<parallel>], iteration_bounds = array<i64: 1>, scalar_prefetch = 0 : i64, scratch_operands = 0 : i64, tpu.core_type = #tpu.core_type<tc>, window_params = [{transform_indices = @transform_0, window_bounds = array<i64: 16, 128>}, {pipeline_mode = #tpu.pipeline_mode<synchronous>, transform_indices = @transform_1, window_bounds = array<i64: 128, 128>}, {pipeline_mode = #tpu.pipeline_mode<synchronous>, transform_indices = @transform_2, window_bounds = array<i64: 1, 128>}, {pipeline_mode = #tpu.pipeline_mode<synchronous>, transform_indices = @transform_3, window_bounds = array<i64: 128, 128>}, {pipeline_mode = #tpu.pipeline_mode<synchronous>, transform_indices = @transform_4, window_bounds = array<i64: 128, 128>}, {pipeline_mode = #tpu.pipeline_mode<synchronous>, transform_indices = @transform_5, window_bounds = array<i64: 1, 128>}, {pipeline_mode = #tpu.pipeline_mode<synchronous>, transform_indices = @transform_6, window_bounds = array<i64: 128, 128>}, {pipeline_mode = #tpu.pipeline_mode<synchronous>, transform_indices = @transform_7, window_bounds = array<i64: 1, 128>}, {transform_indices = @transform_8, window_bounds = array<i64: 16, 128>}]} {
    %c0 = arith.constant 0 : index
    %c0_0 = arith.constant 0 : index
    %0 = vector.load %arg1[%c0, %c0_0] : memref<16x128xbf16, #tpu.memory_space<vmem>>, vector<16x128xbf16>
    %c0_1 = arith.constant 0 : index
    %c0_2 = arith.constant 0 : index
    %1 = vector.load %arg2[%c0_1, %c0_2] : memref<128x128xbf16, #tpu.memory_space<vmem>>, vector<128x128xbf16>
    %cst = arith.constant dense<0.000000e+00> : vector<16x128xf32>
    %2 = tpu.matmul %0, %1, %cst {dimension_numbers = #tpu.dot_dimension_numbers<[1], [0], [0], [1], [0, 0, 1, 1], [], []>} : vector<16x128xbf16>, vector<128x128xbf16>, vector<16x128xf32> -> vector<16x128xf32>
    %c0_3 = arith.constant 0 : index
    %c0_4 = arith.constant 0 : index
    %3 = vector.load %arg3[%c0_3, %c0_4] : memref<1x128xf32, #tpu.memory_space<vmem>>, vector<1x128xf32>
    %4 = vector.broadcast %3 : vector<1x128xf32> to vector<16x128xf32>
    %5 = arith.addf %2, %4 : vector<16x128xf32>
    %cst_5 = arith.constant 0.000000e+00 : f32
    %6 = vector.broadcast %cst_5 : f32 to vector<16x128xf32>
    %7 = arith.maximumf %5, %6 : vector<16x128xf32>
    %8 = arith.truncf %7 : vector<16x128xf32> to vector<16x128xbf16>
    %c0_6 = arith.constant 0 : index
    %c0_7 = arith.constant 0 : index
    %9 = vector.load %arg4[%c0_6, %c0_7] : memref<128x128xbf16, #tpu.memory_space<vmem>>, vector<128x128xbf16>
    %cst_8 = arith.constant dense<0.000000e+00> : vector<16x128xf32>
    %10 = tpu.matmul %8, %9, %cst_8 {dimension_numbers = #tpu.dot_dimension_numbers<[1], [0], [0], [1], [0, 0, 1, 1], [], []>} : vector<16x128xbf16>, vector<128x128xbf16>, vector<16x128xf32> -> vector<16x128xf32>
    %c0_9 = arith.constant 0 : index
    %c0_10 = arith.constant 0 : index
    %11 = vector.load %arg1[%c0_9, %c0_10] : memref<16x128xbf16, #tpu.memory_space<vmem>>, vector<16x128xbf16>
    %c0_11 = arith.constant 0 : index
    %c0_12 = arith.constant 0 : index
    %12 = vector.load %arg5[%c0_11, %c0_12] : memref<128x128xbf16, #tpu.memory_space<vmem>>, vector<128x128xbf16>
    %cst_13 = arith.constant dense<0.000000e+00> : vector<16x128xf32>
    %13 = tpu.matmul %11, %12, %cst_13 {dimension_numbers = #tpu.dot_dimension_numbers<[1], [0], [0], [1], [0, 0, 1, 1], [], []>} : vector<16x128xbf16>, vector<128x128xbf16>, vector<16x128xf32> -> vector<16x128xf32>
    %14 = arith.addf %10, %13 : vector<16x128xf32>
    %c0_14 = arith.constant 0 : index
    %c0_15 = arith.constant 0 : index
    %15 = vector.load %arg6[%c0_14, %c0_15] : memref<1x128xf32, #tpu.memory_space<vmem>>, vector<1x128xf32>
    %16 = vector.broadcast %15 : vector<1x128xf32> to vector<16x128xf32>
    %17 = arith.addf %14, %16 : vector<16x128xf32>
    %cst_16 = arith.constant 0.000000e+00 : f32
    %18 = vector.broadcast %cst_16 : f32 to vector<16x128xf32>
    %19 = arith.maximumf %17, %18 : vector<16x128xf32>
    %20 = arith.truncf %19 : vector<16x128xf32> to vector<16x128xbf16>
    %c0_17 = arith.constant 0 : index
    %c0_18 = arith.constant 0 : index
    %21 = vector.load %arg7[%c0_17, %c0_18] : memref<128x128xbf16, #tpu.memory_space<vmem>>, vector<128x128xbf16>
    %cst_19 = arith.constant dense<0.000000e+00> : vector<16x128xf32>
    %22 = tpu.matmul %20, %21, %cst_19 {dimension_numbers = #tpu.dot_dimension_numbers<[1], [0], [0], [1], [0, 0, 1, 1], [], []>} : vector<16x128xbf16>, vector<128x128xbf16>, vector<16x128xf32> -> vector<16x128xf32>
    %c0_20 = arith.constant 0 : index
    %c0_21 = arith.constant 0 : index
    %23 = vector.load %arg8[%c0_20, %c0_21] : memref<1x128xf32, #tpu.memory_space<vmem>>, vector<1x128xf32>
    %24 = vector.broadcast %23 : vector<1x128xf32> to vector<16x128xf32>
    %25 = arith.addf %22, %24 : vector<16x128xf32>
    %cst_22 = arith.constant 0.000000e+00 : f32
    %26 = vector.broadcast %cst_22 : f32 to vector<16x128xf32>
    %27 = arith.maximumf %25, %26 : vector<16x128xf32>
    %c0_23 = arith.constant 0 : index
    %c0_24 = arith.constant 0 : index
    %28 = vector.load %arg9[%c0_23, %c0_24] : memref<16x128xf32, #tpu.memory_space<vmem>>, vector<16x128xf32>
    tpu.vector_store %arg9[%c0_23, %c0_24], %27 {strides = array<i32>} : memref<16x128xf32, #tpu.memory_space<vmem>>, vector<16x128xf32>,
    return
  }
  func.func @transform_0(%arg0: i32) -> (i32, i32) {
    %c0_i32 = arith.constant 0 : i32
    %c0_i32_0 = arith.constant 0 : i32
    return %arg0, %c0_i32 : i32, i32
  }
  func.func @transform_1(%arg0: i32) -> (i32, i32) {
    %c0_i32 = arith.constant 0 : i32
    %c0_i32_0 = arith.constant 0 : i32
    %c0_i32_1 = arith.constant 0 : i32
    return %c0_i32, %c0_i32_0 : i32, i32
  }
  func.func @transform_2(%arg0: i32) -> (i32, i32) {
    %c0_i32 = arith.constant 0 : i32
    %c0_i32_0 = arith.constant 0 : i32
    %c0_i32_1 = arith.constant 0 : i32
    return %c0_i32, %c0_i32_0 : i32, i32
  }
  func.func @transform_3(%arg0: i32) -> (i32, i32) {
    %c0_i32 = arith.constant 0 : i32
    %c0_i32_0 = arith.constant 0 : i32
    %c0_i32_1 = arith.constant 0 : i32
    return %c0_i32, %c0_i32_0 : i32, i32
  }
  func.func @transform_4(%arg0: i32) -> (i32, i32) {
    %c0_i32 = arith.constant 0 : i32
    %c0_i32_0 = arith.constant 0 : i32
    %c0_i32_1 = arith.constant 0 : i32
    return %c0_i32, %c0_i32_0 : i32, i32
  }
  func.func @transform_5(%arg0: i32) -> (i32, i32) {
    %c0_i32 = arith.constant 0 : i32
    %c0_i32_0 = arith.constant 0 : i32
    %c0_i32_1 = arith.constant 0 : i32
    return %c0_i32, %c0_i32_0 : i32, i32
  }
  func.func @transform_6(%arg0: i32) -> (i32, i32) {
    %c0_i32 = arith.constant 0 : i32
    %c0_i32_0 = arith.constant 0 : i32
    %c0_i32_1 = arith.constant 0 : i32
    return %c0_i32, %c0_i32_0 : i32, i32
  }
  func.func @transform_7(%arg0: i32) -> (i32, i32) {
    %c0_i32 = arith.constant 0 : i32
    %c0_i32_0 = arith.constant 0 : i32
    %c0_i32_1 = arith.constant 0 : i32
    return %c0_i32, %c0_i32_0 : i32, i32
  }
  func.func @transform_8(%arg0: i32) -> (i32, i32) {
    %c0_i32 = arith.constant 0 : i32
    %c0_i32_0 = arith.constant 0 : i32
    return %arg0, %c0_i32 : i32, i32
  }
}

</mosaic_0001>

<bundles_post_ra>
// kernel: deep_neural_network_forward.1
= control target key start
LH: loop header
LB: loop body
LE: loop exit
PB: predicated region body
PF: predicated region fallthrough
CT: control target
= control target key end

     0   :  { %13 = vsyncpa [#allocation3], 0  ;;  %s1025_s0 = inlined_call_operand.vmem [shape: bf16[16,128], index: 0, kind: input, shape index: {}]   ;;  %s1026_s1 = inlined_call_operand.hbm [shape: bf16[128,128], index: 1, kind: input, shape index: {}]   ;;  %s1027_s2 = inlined_call_operand.vmem [shape: f32[1,128], index: 2, kind: input, shape index: {}]   ;;  %s1028_s3 = inlined_call_operand.hbm [shape: bf16[128,128], index: 3, kind: input, shape index: {}]   ;;  %s1029_s4 = inlined_call_operand.hbm [shape: bf16[128,128], index: 4, kind: input, shape index: {}]   ;;  %s1030_s5 = inlined_call_operand.vmem [shape: f32[1,128], index: 5, kind: input, shape index: {}]   ;;  %s1031_s6 = inlined_call_operand.hbm [shape: bf16[128,128], index: 6, kind: input, shape index: {}]   ;;  %s1032_s7 = inlined_call_operand.vmem [shape: f32[1,128], index: 7, kind: input, shape index: {}]   ;;  %s1033_s8 = inlined_call_operand.vmem [shape: f32[16,128], index: 8, kind: output, shape index: {}]  }
   0x1   :  { %14 = vsyncpa [#allocation5], 0 }
   0x2   :  { %15 = vsyncpa [#allocation8], 0  ;;  %s840_s27 = smov [#allocation4]   ;;  %s841_s29 = smov [#allocation2]  }
   0x3   :  { %s37_s28 = sshll.u32 %s840_s27, 4  ;;  %s23_s30 = sshll.u32 %s841_s29, 4  ;;  %s38_s28 = int_to_ptr.vmem [resolvable:$true] %s37_s28  ;;  %s893_s30 = int_to_ptr.vmem [resolvable:$true] %s23_s30 }
   0x4   :  { %s746_s11 = scalar_lea.hbm %s1028_s3, 1024 }
   0x5   :  { %p747_p0 = scmp.ne.s32.totalorder %s1028_s3, %s746_s11  ;;  %p750_p1 = scmp.lt.u32.totalorder %s746_s11, %s1028_s3 }
   0x7   :  { %p752_p2 = pnand %p750_p1, %p747_p0 }
   0x9   :  { %755 = shalt.err (!%p752_p2)
}
   0xa   :  { %s756_s16 = scalar_lea.vmem %s38_s28, 1024  ;;  %p761_p4 = scmp.lt.s32.totalorder %s38_s28, %s38_s28 }
   0xb   :  { %p757_p3 = scmp.ne.s32.totalorder %s38_s28, %s756_s16  ;;  %p762_p5 = scmp.lt.s32.totalorder %s756_s16, %s756_s16 }
   0xd   :  { %p763_p6 = por %p762_p5, %p761_p4 }
   0xf   :  { %p764_p7 = pnand %p763_p6, %p757_p3 }
  0x11   :  { %767 = shalt.err (!%p764_p7)
}
  0x12   :  { %s842_s17 = smov 64   ;;  %s843_s18 = smov 4  }
  0x13   :  { %43 = dma.hbm_to_vmem [thread:$0]  %s1028_s3, 1024, %s38_s28, [#allocation5], %s842_s17, %s842_s17, %s843_s18  }
  0x14   :  { %s768_s23 = scalar_lea.hbm %s1026_s1, 1024 }
  0x15   :  { %p769_p8 = scmp.ne.s32.totalorder %s1026_s1, %s768_s23  ;;  %p772_p9 = scmp.lt.u32.totalorder %s768_s23, %s1026_s1 }
  0x17   :  { %p774_p10 = pnand %p772_p9, %p769_p8 }
  0x19   :  { %777 = shalt.err (!%p774_p10)
}
  0x1a   :  { %s778_s29 = scalar_lea.vmem %s893_s30, 1024  ;;  %p783_p12 = scmp.lt.s32.totalorder %s893_s30, %s893_s30 }
  0x1b   :  { %p779_p11 = scmp.ne.s32.totalorder %s893_s30, %s778_s29  ;;  %p784_p13 = scmp.lt.s32.totalorder %s778_s29, %s778_s29 }
  0x1d   :  { %p785_p0 = por %p784_p13, %p783_p12 }
  0x1f   :  { %p786_p1 = pnand %p785_p0, %p779_p11 }
  0x21   :  { %789 = shalt.err (!%p786_p1)
}
  0x22   :  { %29 = dma.hbm_to_vmem [thread:$0]  %s1026_s1, 1024, %s893_s30, [#allocation3], %s842_s17, %s842_s17, %s843_s18  }
  0x23   :  { %s844_s9 = smov [#allocation6]   ;;  %s845_s11 = smov [#allocation7]  }
  0x24   :  { %s49_s10 = sshll.u32 %s844_s9, 4  ;;  %s63_s12 = sshll.u32 %s845_s11, 4  ;;  %s50_s10 = int_to_ptr.vmem [resolvable:$true] %s49_s10  ;;  %s930_s12 = int_to_ptr.vmem [resolvable:$true] %s63_s12 }
  0x25   :  { %s790_s15 = scalar_lea.hbm %s1029_s4, 1024 }
  0x26   :  { %p791_p2 = scmp.ne.s32.totalorder %s1029_s4, %s790_s15  ;;  %p794_p3 = scmp.lt.u32.totalorder %s790_s15, %s1029_s4 }
  0x28   :  { %p796_p4 = pnand %p794_p3, %p791_p2 }
  0x2a   :  { %799 = shalt.err (!%p796_p4)
}
  0x2b   :  { %s800_s1 = scalar_lea.vmem %s50_s10, 1024  ;;  %p805_p6 = scmp.lt.s32.totalorder %s50_s10, %s50_s10 }
  0x2c   :  { %p801_p5 = scmp.ne.s32.totalorder %s50_s10, %s800_s1  ;;  %p806_p7 = scmp.lt.s32.totalorder %s800_s1, %s800_s1 }
  0x2e   :  { %p807_p8 = por %p806_p7, %p805_p6 }
  0x30   :  { %p808_p9 = pnand %p807_p8, %p801_p5 }
  0x32   :  { %811 = shalt.err (!%p808_p9)
}
  0x33   :  { %55 = dma.hbm_to_vmem [thread:$0]  %s1029_s4, 1024, %s50_s10, [#allocation5], %s842_s17, %s842_s17, %s843_s18  }
  0x34   :  { %s812_s25 = scalar_lea.hbm %s1031_s6, 1024 }
  0x35   :  { %p813_p10 = scmp.ne.s32.totalorder %s1031_s6, %s812_s25  ;;  %p816_p11 = scmp.lt.u32.totalorder %s812_s25, %s1031_s6 }
  0x37   :  { %p818_p12 = pnand %p816_p11, %p813_p10 }
  0x39   :  { %821 = shalt.err (!%p818_p12)
}
  0x3a   :  { %s822_s28 = scalar_lea.vmem %s930_s12, 1024  ;;  %p827_p0 = scmp.lt.s32.totalorder %s930_s12, %s930_s12 }
  0x3b   :  { %p823_p13 = scmp.ne.s32.totalorder %s930_s12, %s822_s28  ;;  %p828_p1 = scmp.lt.s32.totalorder %s822_s28, %s822_s28 }
  0x3d   :  { %p829_p2 = por %p828_p1, %p827_p0 }
  0x3f   :  { %p830_p3 = pnand %p829_p2, %p823_p13 }
  0x41   :  { %833 = shalt.err (!%p830_p3)
}
  0x42   :  { %69 = dma.hbm_to_vmem [thread:$0]  %s1031_s6, 1024, %s930_s12, [#allocation8], %s842_s17, %s842_s17, %s843_s18  }
  0x43   :  { %834 = dma.done.wait [#allocation3], 1024  }
  0x44   :  { %835 = vsyncadd [#allocation3], 4294966272 }
  0x45   :  { %836 = dma.done.wait [#allocation5], 2048  }
  0x46   :  { %837 = vsyncadd [#allocation5], 4294965248 }
  0x47   :  { %838 = dma.done.wait [#allocation8], 1024  }
  0x48   :  { %839 = vsyncadd [#allocation8], 4294966272  ;;  %v846_v0 = vmov 0.0   ;;  %vm847_vm0 = vmmov 0   ;;  %v713_v1 = vld [vmem:[#allocation2] sm:$0xff]   ;;  %v714_v2 = vld [vmem:[#allocation2 + $0x8] sm:$0xff]  }
  0x49   :  { %625 = vmatprep.subr.bf16.mxu0 %v846_v0  ;;  %641 = vmatprep.mubr.msk.bf16.mxu0 %vm847_vm0, %v846_v0  ;;  %v715_v3 = vld [vmem:[#allocation2 + $0x10] sm:$0xff]   ;;  %v722_v4 = vld [vmem:[#allocation6] sm:$0xff]   ;;  %v716_v5 = vld [vmem:[#allocation2 + $0x18] sm:$0xff]  }
  0x4a   :  { %645 = vmatprep.subr.bf16.mxu1 %v846_v0  ;;  %661 = vmatprep.mubr.msk.bf16.mxu1 %vm847_vm0, %v846_v0  ;;  %v724_v6 = vld [vmem:[#allocation6 + $0x8] sm:$0xff]   ;;  %v717_v7 = vld [vmem:[#allocation2 + $0x20] sm:$0xff]   ;;  %v726_v8 = vld [vmem:[#allocation6 + $0x10] sm:$0xff]  }
  0x4b   :  { %626 = vmatpush3.bf16.msra.mxu0 %v713_v1  ;;  %646 = vmatpush3.bf16.msra.mxu1 %v722_v4  ;;  %v718_v9 = vld [vmem:[#allocation2 + $0x28] sm:$0xff]   ;;  %v728_v10 = vld [vmem:[#allocation6 + $0x18] sm:$0xff]   ;;  %v719_v11 = vld [vmem:[#allocation2 + $0x30] sm:$0xff]  }
  0x4c   :  { %627 = vmatprep.subr.bf16.mxu0 %v846_v0  ;;  %647 = vmatprep.subr.bf16.mxu1 %v846_v0  ;;  %v730_v12 = vld [vmem:[#allocation6 + $0x20] sm:$0xff]   ;;  %v720_v13 = vld [vmem:[#allocation2 + $0x38] sm:$0xff]   ;;  %v732_v14 = vld [vmem:[#allocation6 + $0x28] sm:$0xff]  }
  0x4d   :  { %v721_v15 = vld [vmem:[%s1025_s0] sm:$0xff]   ;;  %v734_v17 = vld [vmem:[#allocation6 + $0x30] sm:$0xff]   ;;  %v725_v18 = vld [vmem:[#allocation4 + $0x8] sm:$0xff]  }
  0x4e   :  { %v723_v16 = vld [vmem:[#allocation4] sm:$0xff]   ;;  %v727_v19 = vld [vmem:[#allocation4 + $0x10] sm:$0xff]   ;;  %v729_v20 = vld [vmem:[#allocation4 + $0x18] sm:$0xff]  }
  0x4f   :  { %628 = vmatpush3.bf16.msra.mxu0 %v714_v2  ;;  %648 = vmatpush3.bf16.msra.mxu1 %v724_v6  ;;  %v731_v21 = vld [vmem:[#allocation4 + $0x20] sm:$0xff]   ;;  %v733_v22 = vld [vmem:[#allocation4 + $0x28] sm:$0xff]   ;;  %v735_v23 = vld [vmem:[#allocation4 + $0x30] sm:$0xff]  }
  0x50   :  { %629 = vmatprep.subr.bf16.mxu0 %v846_v0  ;;  %649 = vmatprep.subr.bf16.mxu1 %v846_v0  ;;  %v736_v24 = vld [vmem:[#allocation6 + $0x38] sm:$0xff]   ;;  %v738_v26 = vld [vmem:[#allocation7] sm:$0xff]   ;;  %v739_v27 = vld [vmem:[#allocation7 + $0x8] sm:$0xff]  }
  0x51   :  { %v737_v25 = vld [vmem:[#allocation4 + $0x38] sm:$0xff]   ;;  %v740_v28 = vld [vmem:[#allocation7 + $0x10] sm:$0xff]   ;;  %v742_v30 = vld [vmem:[#allocation7 + $0x20] sm:$0xff]  }
  0x52   :  { %v741_v29 = vld [vmem:[#allocation7 + $0x18] sm:$0xff]   ;;  %v553_v31 = vld [vmem:[%s1027_s2] ss:$0 sm:$0xff]  ;;  %v743_v43 = vld [vmem:[#allocation7 + $0x28] sm:$0xff]  }
  0x53   :  { %630 = vmatpush3.bf16.msra.mxu0 %v715_v3  ;;  %650 = vmatpush3.bf16.msra.mxu1 %v726_v8  ;;  %v744_v46 = vld [vmem:[#allocation7 + $0x30] sm:$0xff]   ;;  %v745_v47 = vld [vmem:[#allocation7 + $0x38] sm:$0xff]   ;;  %v579_v49 = vld [vmem:[%s1030_s5] ss:$0 sm:$0xff] }
  0x54   :  { %631 = vmatprep.subr.bf16.mxu0 %v846_v0  ;;  %651 = vmatprep.subr.bf16.mxu1 %v846_v0  ;;  %v580_v60 = vld [vmem:[%s1032_s7] ss:$0 sm:$0xff] }
  0x57   :  { %632 = vmatpush3.bf16.msra.mxu0 %v716_v5  ;;  %652 = vmatpush3.bf16.msra.mxu1 %v728_v10 }
  0x58   :  { %633 = vmatprep.subr.bf16.mxu0 %v846_v0  ;;  %653 = vmatprep.subr.bf16.mxu1 %v846_v0 }
  0x5b   :  { %634 = vmatpush3.bf16.msra.mxu0 %v717_v7  ;;  %654 = vmatpush3.bf16.msra.mxu1 %v730_v12 }
  0x5c   :  { %635 = vmatprep.subr.bf16.mxu0 %v846_v0  ;;  %655 = vmatprep.subr.bf16.mxu1 %v846_v0 }
  0x5f   :  { %636 = vmatpush3.bf16.msra.mxu0 %v718_v9  ;;  %656 = vmatpush3.bf16.msra.mxu1 %v732_v14 }
  0x60   :  { %637 = vmatprep.subr.bf16.mxu0 %v846_v0  ;;  %657 = vmatprep.subr.bf16.mxu1 %v846_v0 }
  0x63   :  { %638 = vmatpush3.bf16.msra.mxu0 %v719_v11  ;;  %658 = vmatpush3.bf16.msra.mxu1 %v734_v17 }
  0x64   :  { %639 = vmatprep.subr.bf16.mxu0 %v846_v0  ;;  %659 = vmatprep.subr.bf16.mxu1 %v846_v0 }
  0x67   :  { %640 = vmatpush3.bf16.msra.mxu0 %v720_v13  ;;  %660 = vmatpush3.bf16.msra.mxu1 %v736_v24 }
  0x68   :  { %665 = vmatprep.subr.bf16.mxu0 %v846_v0  ;;  %685 = vmatprep.subr.bf16.mxu1 %v846_v0 }
  0x6a   :  { %642 = vmatmul.mubr.bf16.vlgmr.msra.gmra.mrb[0].mxu0 %v721_v15  ;;  %662 = vmatmul.mubr.bf16.vlgmr.msra.gmra.mrb[0].mxu1 %v721_v15 }
  0x6b   :  { %666 = vmatpush3.bf16.msra.mxu0 %v723_v16  ;;  %681 = vmatprep.mubr.msk.bf16.mxu0 %vm847_vm0, %v846_v0 }
  0x6c   :  { %667 = vmatprep.subr.bf16.mxu0 %v846_v0  ;;  %701 = vmatprep.mubr.msk.bf16.mxu1 %vm847_vm0, %v846_v0 }
  0x6d   :  { %686 = vmatpush3.bf16.msra.mxu1 %v738_v26 }
  0x6e   :  { %687 = vmatprep.subr.bf16.mxu1 %v846_v0 }
  0x6f   :  { %668 = vmatpush3.bf16.msra.mxu0 %v725_v18 }
  0x70   :  { %669 = vmatprep.subr.bf16.mxu0 %v846_v0 }
  0x71   :  { %688 = vmatpush3.bf16.msra.mxu1 %v739_v27 }
  0x72   :  { %689 = vmatprep.subr.bf16.mxu1 %v846_v0 }
  0x73   :  { %670 = vmatpush3.bf16.msra.mxu0 %v727_v19 }
  0x74   :  { %671 = vmatprep.subr.bf16.mxu0 %v846_v0 }
  0x75   :  { %690 = vmatpush3.bf16.msra.mxu1 %v740_v28 }
  0x76   :  { %691 = vmatprep.subr.bf16.mxu1 %v846_v0 }
  0x77   :  { %672 = vmatpush3.bf16.msra.mxu0 %v729_v20 }
  0x78   :  { %673 = vmatprep.subr.bf16.mxu0 %v846_v0 }
  0x79   :  { %692 = vmatpush3.bf16.msra.mxu1 %v741_v29 }
  0x7a   :  { %693 = vmatprep.subr.bf16.mxu1 %v846_v0 }
  0x7b   :  { %674 = vmatpush3.bf16.msra.mxu0 %v731_v21 }
  0x7c   :  { %675 = vmatprep.subr.bf16.mxu0 %v846_v0 }
  0x7d   :  { %694 = vmatpush3.bf16.msra.mxu1 %v742_v30 }
  0x7e   :  { %695 = vmatprep.subr.bf16.mxu1 %v846_v0 }
  0x7f   :  { %676 = vmatpush3.bf16.msra.mxu0 %v733_v22 }
  0x80   :  { %677 = vmatprep.subr.bf16.mxu0 %v846_v0 }
  0x81   :  { %696 = vmatpush3.bf16.msra.mxu1 %v743_v43 }
  0x82   :  { %697 = vmatprep.subr.bf16.mxu1 %v846_v0 }
  0x83   :  { %678 = vmatpush3.bf16.msra.mxu0 %v735_v23 }
  0x84   :  { %679 = vmatprep.subr.bf16.mxu0 %v846_v0 }
  0x85   :  { %698 = vmatpush3.bf16.msra.mxu1 %v744_v46 }
  0x86   :  { %699 = vmatprep.subr.bf16.mxu1 %v846_v0 }
  0x87   :  { %680 = vmatpush3.bf16.msra.mxu0 %v737_v25 }
  0x89   :  { %700 = vmatpush3.bf16.msra.mxu1 %v745_v47 }
 0x13d   :  { %v198_v32 = vpop.f32.mrb[0].mxu0  ;;  %v322_v41 = vpop.f32.mrb[0].mxu1 }
 0x13e   :  { %v199_v33 = vadd.f32 %v553_v31, %v198_v32  ;;  %v643_v34 = vpop.f32.mrb[1].mxu0  ;;  %v663_v42 = vpop.f32.mrb[1].mxu1 }
 0x13f   :  { %v201_v35 = vpop.f32.mrb[2].mxu0  ;;  %v325_v44 = vpop.f32.mrb[2].mxu1 }
 0x140   :  { %v202_v36 = vadd.f32 %v553_v31, %v201_v35  ;;  %v644_v37 = vpop.f32.mrb[3].mxu0  ;;  %v205_v38 = vmax.f32 %v199_v33, 0.0  ;;  %v664_v45 = vpop.f32.mrb[3].mxu1 }
 0x142   :  { %v206_v39 = vmax.f32 %v202_v36, 0.0 }
 0x144   :  { %v207_v40 = vpack.c.bf16 %v206_v39, %v205_v38 }
 0x146   :  { %682 = vmatmul.mubr.bf16.vlgmr.msra.gmra.mrb[4].mxu0 %v207_v40 }
 0x219   :  { %v411_v48 = vpop.f32.mrb[4].mxu0 }
 0x21a   :  { %v412_v50 = vadd.f32 %v411_v48, %v322_v41  ;;  %v683_v51 = vpop.f32.mrb[5].mxu0 }
 0x21b   :  { %v414_v52 = vpop.f32.mrb[6].mxu0 }
 0x21c   :  { %v425_v53 = vadd.f32 %v579_v49, %v412_v50  ;;  %v415_v54 = vadd.f32 %v414_v52, %v325_v44  ;;  %v684_v55 = vpop.f32.mrb[7].mxu0 }
 0x21e   :  { %v426_v56 = vadd.f32 %v579_v49, %v415_v54  ;;  %v427_v57 = vmax.f32 %v425_v53, 0.0 }
 0x220   :  { %v428_v58 = vmax.f32 %v426_v56, 0.0 }
 0x222   :  { %v429_v59 = vpack.c.bf16 %v428_v58, %v427_v57 }
 0x224   :  { %702 = vmatmul.mubr.bf16.vlgmr.msra.gmra.mrb[4].mxu1 %v429_v59 }
 0x2f7   :  { %v535_v61 = vpop.f32.mrb[4].mxu1 }
 0x2f8   :  { %v536_v62 = vadd.f32 %v580_v60, %v535_v61  ;;  %v703_v63 = vpop.f32.mrb[5].mxu1 }
 0x2f9   :  { %v538_v0 = vpop.f32.mrb[6].mxu1 }
 0x2fa   :  { %v542_v1 = vmax.f32 %v536_v62, 0.0  ;;  %v539_v2 = vadd.f32 %v580_v60, %v538_v0  ;;  %v704_v3 = vpop.f32.mrb[7].mxu1 }
 0x2fc   :  { %544 = vst [vmem:[%s1033_s8] sm:$0xff] %v542_v1  ;;  %v543_v4 = vmax.f32 %v539_v2, 0.0 }
 0x2fe   :  { %545 = vst [vmem:[%s1033_s8 + $0x8] sm:$0xff] %v543_v4 }
 0x2ff   :  { %550 = vsyncpa [#allocation3], 1 }
 0x300   :  { %551 = vsyncpa [#allocation5], 1 }
 0x301   :  { %552 = vsyncpa [#allocation8], 1 }

</bundles_post_ra>
